<compile_context>
chip_gen: v7x
topology: tpu7x:2x2x1
jax: 0.10.0
libtpu: 0.0.40
codegen_flags: <defaults>
</compile_context>

<pallas_src>
import jax
import jax.numpy as jnp
from jax.experimental import pallas as pl
from jax.experimental.pallas import tpu as pltpu


def _round_up(a, b):
    return ((a + b - 1) // b) * b


def _sampler_kernel(x_ref, wtm_ref, bm_ref, wtl_ref, bl_ref, eps_ref,
                    samples_ref, mean_ref, logvar_ref):
    # x_ref:    (tm, size)    row tile of inputs
    # wtm_ref:  (size, size)  W_mean^T   (resident, constant block index)
    # bm_ref:   (1, size)     b_mean
    # wtl_ref:  (size, size)  W_logvar^T (resident, constant block index)
    # bl_ref:   (1, size)     b_logvar
    # eps_ref:  (tm, size)    pre-generated standard-normal noise tile
    x = x_ref[...]

    # Two lane-aligned MXU matmuls with f32 accumulation; no post-matmul slicing.
    z_mean = jnp.dot(x, wtm_ref[...],
                     preferred_element_type=jnp.float32) + bm_ref[...]
    z_logvar = jnp.dot(x, wtl_ref[...],
                       preferred_element_type=jnp.float32) + bl_ref[...]

    samples = z_mean + jnp.exp(0.5 * z_logvar) * eps_ref[...].astype(jnp.float32)

    samples_ref[...] = samples.astype(samples_ref.dtype)
    mean_ref[...] = z_mean.astype(mean_ref.dtype)
    logvar_ref[...] = z_logvar.astype(logvar_ref.dtype)


def sampler_forward(x, weight, bias, eps, *, tm=256, use_bf16_matmul=False):
    """x: (B, S, size) f32, weight: (2*size, size) (PyTorch nn.Linear layout),
    bias: (2*size,), eps: (B, S, size) standard-normal noise.
    Returns (samples, z_mean, z_logvar), each (B, S, size)."""
    orig_dtype = x.dtype
    B, S, size = x.shape
    M = B * S

    # Large row tile, clamped for small M; pad rows so grid = M_pad // tm_eff.
    tm_eff = min(tm, _round_up(M, 8))
    M_pad = _round_up(M, tm_eff)
    grid = M_pad // tm_eff

    x2 = x.reshape(M, size)
    eps2 = eps.reshape(M, size).astype(jnp.float32)
    if M_pad != M:
        pad = ((0, M_pad - M), (0, 0))
        x2 = jnp.pad(x2, pad)
        eps2 = jnp.pad(eps2, pad)

    # Split the linear layer into lane-dense mean / logvar halves.
    wt_mean = weight[:size, :].T                      # (size, size)
    wt_logvar = weight[size:, :].T                    # (size, size)
    b_mean = bias[:size].reshape(1, size).astype(jnp.float32)
    b_logvar = bias[size:].reshape(1, size).astype(jnp.float32)

    if use_bf16_matmul:  # v6e / v7x: halve HBM + VMEM for the MXU operands.
        x2 = x2.astype(jnp.bfloat16)
        wt_mean = wt_mean.astype(jnp.bfloat16)
        wt_logvar = wt_logvar.astype(jnp.bfloat16)

    out_shape = jax.ShapeDtypeStruct((M_pad, size), orig_dtype)

    in_specs = [
        pl.BlockSpec((tm_eff, size), lambda i: (i, 0)),    # x row tile
        pl.BlockSpec((size, size), lambda i: (0, 0)),      # W_mean^T (resident)
        pl.BlockSpec((1, size), lambda i: (0, 0)),         # b_mean
        pl.BlockSpec((size, size), lambda i: (0, 0)),      # W_logvar^T (resident)
        pl.BlockSpec((1, size), lambda i: (0, 0)),         # b_logvar
        pl.BlockSpec((tm_eff, size), lambda i: (i, 0)),    # eps row tile
    ]
    out_specs = [
        pl.BlockSpec((tm_eff, size), lambda i: (i, 0)),    # samples
        pl.BlockSpec((tm_eff, size), lambda i: (i, 0)),    # z_mean
        pl.BlockSpec((tm_eff, size), lambda i: (i, 0)),    # z_logvar
    ]

    # Explicit scoped-VMEM budget: double-buffered x + eps + 3 outputs, weights
    # and biases (conservatively counted as double-buffered), 2x headroom;
    # capped below the 64 MiB physical VMEM of v7x.
    x_bytes = x2.dtype.itemsize
    w_bytes = wt_mean.dtype.itemsize
    o_bytes = jnp.dtype(orig_dtype).itemsize
    need = (2 * tm_eff * size * (x_bytes + 4)            # x + eps (f32) tiles
            + 2 * 3 * tm_eff * size * o_bytes            # 3 output tiles
            + 2 * 2 * size * size * w_bytes              # 2 resident weights
            + 2 * 2 * size * 4)                          # 2 biases
    vmem_limit = int(min(56 * 1024 * 1024, max(32 * 1024 * 1024, 2 * need)))

    samples, z_mean, z_logvar = pl.pallas_call(
        _sampler_kernel,
        out_shape=(out_shape, out_shape, out_shape),
        grid=(grid,),
        in_specs=in_specs,
        out_specs=out_specs,
        compiler_params=pltpu.CompilerParams(
            dimension_semantics=("parallel",),
            vmem_limit_bytes=vmem_limit,
        ),
    )(x2, wt_mean, b_mean, wt_logvar, b_logvar, eps2)

    def _unpad(a):
        return a[:M].reshape(B, S, size)

    return _unpad(samples), _unpad(z_mean), _unpad(z_logvar)


if __name__ == "__main__":
    # size is a multiple of 128 so all three output streams are lane-dense.
    B, S, size = 2, 8, 128

    key = jax.random.PRNGKey(0)
    kx, kw, kb, ke = jax.random.split(key, 4)

    # Deterministic "parameters" mimicking nn.Linear(size, 2*size):
    # weight: (2*size, size), bias: (2*size,)  (PyTorch layout)
    bound = 1.0 / (size ** 0.5)
    weight = jax.random.uniform(kw, (2 * size, size), jnp.float32,
                                minval=-bound, maxval=bound)
    bias = jax.random.uniform(kb, (2 * size,), jnp.float32,
                              minval=-bound, maxval=bound)
    x = jax.random.normal(kx, (B, S, size), jnp.float32)
    eps = jax.random.normal(ke, (B, S, size), jnp.float32)

    samples, z_mean, z_logvar = sampler_forward(x, weight, bias, eps)
    jax.block_until_ready((samples, z_mean, z_logvar))

    # Reference in plain JAX.
    z_ref = jnp.einsum("bsd,od->bso", x, weight) + bias
    zm_ref = z_ref[..., :size]
    zl_ref = z_ref[..., size:]
    samples_ref = zm_ref + jnp.exp(0.5 * zl_ref) * eps

    assert jnp.allclose(z_mean, zm_ref, atol=1e-4, rtol=1e-4)
    assert jnp.allclose(z_logvar, zl_ref, atol=1e-4, rtol=1e-4)
    assert jnp.allclose(samples, samples_ref, atol=1e-4, rtol=1e-4)
    assert bool(jnp.all(jnp.isfinite(samples)))

    print("KERNEL_OK")
</pallas_src>

<mosaic_0001>
module attributes {stable_mosaic.version = 11 : i64} {
  func.func @_sampler_kernel(%arg0: i32, %arg1: memref<16x128xf32, #tpu.memory_space<vmem>>, %arg2: memref<128x128xf32, #tpu.memory_space<vmem>>, %arg3: memref<1x128xf32, #tpu.memory_space<vmem>>, %arg4: memref<128x128xf32, #tpu.memory_space<vmem>>, %arg5: memref<1x128xf32, #tpu.memory_space<vmem>>, %arg6: memref<16x128xf32, #tpu.memory_space<vmem>>, %arg7: memref<16x128xf32, #tpu.memory_space<vmem>>, %arg8: memref<16x128xf32, #tpu.memory_space<vmem>>, %arg9: memref<16x128xf32, #tpu.memory_space<vmem>>) attributes {dimension_semantics = [#tpu.dimension_semantics<parallel>], iteration_bounds = array<i64: 1>, scalar_prefetch = 0 : i64, scratch_operands = 0 : i64, tpu.core_type = #tpu.core_type<tc>, window_params = [{transform_indices = @transform_0, window_bounds = array<i64: 16, 128>}, {pipeline_mode = #tpu.pipeline_mode<synchronous>, transform_indices = @transform_1, window_bounds = array<i64: 128, 128>}, {pipeline_mode = #tpu.pipeline_mode<synchronous>, transform_indices = @transform_2, window_bounds = array<i64: 1, 128>}, {pipeline_mode = #tpu.pipeline_mode<synchronous>, transform_indices = @transform_3, window_bounds = array<i64: 128, 128>}, {pipeline_mode = #tpu.pipeline_mode<synchronous>, transform_indices = @transform_4, window_bounds = array<i64: 1, 128>}, {transform_indices = @transform_5, window_bounds = array<i64: 16, 128>}, {transform_indices = @transform_6, window_bounds = array<i64: 16, 128>}, {transform_indices = @transform_7, window_bounds = array<i64: 16, 128>}, {transform_indices = @transform_8, window_bounds = array<i64: 16, 128>}]} {
    %c0 = arith.constant 0 : index
    %c0_0 = arith.constant 0 : index
    %0 = vector.load %arg1[%c0, %c0_0] : memref<16x128xf32, #tpu.memory_space<vmem>>, vector<16x128xf32>
    %c0_1 = arith.constant 0 : index
    %c0_2 = arith.constant 0 : index
    %1 = vector.load %arg2[%c0_1, %c0_2] : memref<128x128xf32, #tpu.memory_space<vmem>>, vector<128x128xf32>
    %cst = arith.constant dense<0.000000e+00> : vector<16x128xf32>
    %2 = tpu.matmul %0, %1, %cst {dimension_numbers = #tpu.dot_dimension_numbers<[1], [0], [0], [1], [0, 0, 1, 1], [], []>} : vector<16x128xf32>, vector<128x128xf32>, vector<16x128xf32> -> vector<16x128xf32>
    %c0_3 = arith.constant 0 : index
    %c0_4 = arith.constant 0 : index
    %3 = vector.load %arg3[%c0_3, %c0_4] : memref<1x128xf32, #tpu.memory_space<vmem>>, vector<1x128xf32>
    %4 = vector.broadcast %3 : vector<1x128xf32> to vector<16x128xf32>
    %5 = arith.addf %2, %4 : vector<16x128xf32>
    %c0_5 = arith.constant 0 : index
    %c0_6 = arith.constant 0 : index
    %6 = vector.load %arg4[%c0_5, %c0_6] : memref<128x128xf32, #tpu.memory_space<vmem>>, vector<128x128xf32>
    %cst_7 = arith.constant dense<0.000000e+00> : vector<16x128xf32>
    %7 = tpu.matmul %0, %6, %cst_7 {dimension_numbers = #tpu.dot_dimension_numbers<[1], [0], [0], [1], [0, 0, 1, 1], [], []>} : vector<16x128xf32>, vector<128x128xf32>, vector<16x128xf32> -> vector<16x128xf32>
    %c0_8 = arith.constant 0 : index
    %c0_9 = arith.constant 0 : index
    %8 = vector.load %arg5[%c0_8, %c0_9] : memref<1x128xf32, #tpu.memory_space<vmem>>, vector<1x128xf32>
    %9 = vector.broadcast %8 : vector<1x128xf32> to vector<16x128xf32>
    %10 = arith.addf %7, %9 : vector<16x128xf32>
    %cst_10 = arith.constant 5.000000e-01 : f32
    %11 = vector.broadcast %cst_10 : f32 to vector<16x128xf32>
    %12 = arith.mulf %11, %10 : vector<16x128xf32>
    %13 = math.exp %12 : vector<16x128xf32>
    %c0_11 = arith.constant 0 : index
    %c0_12 = arith.constant 0 : index
    %14 = vector.load %arg6[%c0_11, %c0_12] : memref<16x128xf32, #tpu.memory_space<vmem>>, vector<16x128xf32>
    %15 = arith.mulf %13, %14 : vector<16x128xf32>
    %16 = arith.addf %5, %15 : vector<16x128xf32>
    %c0_13 = arith.constant 0 : index
    %c0_14 = arith.constant 0 : index
    %17 = vector.load %arg7[%c0_13, %c0_14] : memref<16x128xf32, #tpu.memory_space<vmem>>, vector<16x128xf32>
    tpu.vector_store %arg7[%c0_13, %c0_14], %16 {strides = array<i32>} : memref<16x128xf32, #tpu.memory_space<vmem>>, vector<16x128xf32>,
    %c0_15 = arith.constant 0 : index
    %c0_16 = arith.constant 0 : index
    %18 = vector.load %arg8[%c0_15, %c0_16] : memref<16x128xf32, #tpu.memory_space<vmem>>, vector<16x128xf32>
    tpu.vector_store %arg8[%c0_15, %c0_16], %5 {strides = array<i32>} : memref<16x128xf32, #tpu.memory_space<vmem>>, vector<16x128xf32>,
    %c0_17 = arith.constant 0 : index
    %c0_18 = arith.constant 0 : index
    %19 = vector.load %arg9[%c0_17, %c0_18] : memref<16x128xf32, #tpu.memory_space<vmem>>, vector<16x128xf32>
    tpu.vector_store %arg9[%c0_17, %c0_18], %10 {strides = array<i32>} : memref<16x128xf32, #tpu.memory_space<vmem>>, vector<16x128xf32>,
    return
  }
  func.func @transform_0(%arg0: i32) -> (i32, i32) {
    %c0_i32 = arith.constant 0 : i32
    %c0_i32_0 = arith.constant 0 : i32
    return %arg0, %c0_i32 : i32, i32
  }
  func.func @transform_1(%arg0: i32) -> (i32, i32) {
    %c0_i32 = arith.constant 0 : i32
    %c0_i32_0 = arith.constant 0 : i32
    %c0_i32_1 = arith.constant 0 : i32
    return %c0_i32, %c0_i32_0 : i32, i32
  }
  func.func @transform_2(%arg0: i32) -> (i32, i32) {
    %c0_i32 = arith.constant 0 : i32
    %c0_i32_0 = arith.constant 0 : i32
    %c0_i32_1 = arith.constant 0 : i32
    return %c0_i32, %c0_i32_0 : i32, i32
  }
  func.func @transform_3(%arg0: i32) -> (i32, i32) {
    %c0_i32 = arith.constant 0 : i32
    %c0_i32_0 = arith.constant 0 : i32
    %c0_i32_1 = arith.constant 0 : i32
    return %c0_i32, %c0_i32_0 : i32, i32
  }
  func.func @transform_4(%arg0: i32) -> (i32, i32) {
    %c0_i32 = arith.constant 0 : i32
    %c0_i32_0 = arith.constant 0 : i32
    %c0_i32_1 = arith.constant 0 : i32
    return %c0_i32, %c0_i32_0 : i32, i32
  }
  func.func @transform_5(%arg0: i32) -> (i32, i32) {
    %c0_i32 = arith.constant 0 : i32
    %c0_i32_0 = arith.constant 0 : i32
    return %arg0, %c0_i32 : i32, i32
  }
  func.func @transform_6(%arg0: i32) -> (i32, i32) {
    %c0_i32 = arith.constant 0 : i32
    %c0_i32_0 = arith.constant 0 : i32
    return %arg0, %c0_i32 : i32, i32
  }
  func.func @transform_7(%arg0: i32) -> (i32, i32) {
    %c0_i32 = arith.constant 0 : i32
    %c0_i32_0 = arith.constant 0 : i32
    return %arg0, %c0_i32 : i32, i32
  }
  func.func @transform_8(%arg0: i32) -> (i32, i32) {
    %c0_i32 = arith.constant 0 : i32
    %c0_i32_0 = arith.constant 0 : i32
    return %arg0, %c0_i32 : i32, i32
  }
}

</mosaic_0001>

<bundles_post_ra>
// kernel: tpu_custom_call.1
= control target key start
LH: loop header
LB: loop body
LE: loop exit
PB: predicated region body
PF: predicated region fallthrough
CT: control target
= control target key end

     0   :  { %14 = vsyncpa [#allocation3], 0  ;;  %s827_s0 = inlined_call_operand.hbm [shape: f32[16,128], index: 0, kind: input, shape index: {}]   ;;  %s828_s1 = inlined_call_operand.hbm [shape: f32[128,128], index: 1, kind: input, shape index: {}]   ;;  %s829_s2 = inlined_call_operand.vmem [shape: f32[1,128], index: 2, kind: input, shape index: {}]   ;;  %s830_s3 = inlined_call_operand.hbm [shape: f32[128,128], index: 3, kind: input, shape index: {}]   ;;  %s831_s4 = inlined_call_operand.vmem [shape: f32[1,128], index: 4, kind: input, shape index: {}]   ;;  %s832_s5 = inlined_call_operand.vmem [shape: f32[16,128], index: 5, kind: input, shape index: {}]   ;;  %s833_s6 = inlined_call_operand.hbm [shape: f32[16,128], index: 6, kind: output, shape index: {0}]   ;;  %s834_s7 = inlined_call_operand.hbm [shape: f32[16,128], index: 7, kind: output, shape index: {1}]   ;;  %s835_s8 = inlined_call_operand.hbm [shape: f32[16,128], index: 8, kind: output, shape index: {2}]  }
   0x1   :  { %15 = vsyncpa [#allocation6], 0 }
   0x2   :  { %16 = vsyncpa [#allocation4], 0 }
   0x3   :  { %17 = vsyncpa [#allocation10], 0  ;;  %s658_s27 = smov [#allocation5]   ;;  %s659_s29 = smov [#allocation2]  }
   0x4   :  { %s35_s28 = sshll.u32 %s658_s27, 4  ;;  %s23_s30 = sshll.u32 %s659_s29, 4  ;;  %s36_s28 = int_to_ptr.vmem [resolvable:$true] %s35_s28  ;;  %s711_s30 = int_to_ptr.vmem [resolvable:$true] %s23_s30 }
   0x5   :  { %s518_s11 = scalar_lea.hbm %s828_s1, 2048 }
   0x6   :  { %p519_p0 = scmp.ne.s32.totalorder %s828_s1, %s518_s11  ;;  %p522_p1 = scmp.lt.u32.totalorder %s518_s11, %s828_s1 }
   0x8   :  { %p524_p2 = pnand %p522_p1, %p519_p0 }
   0xa   :  { %527 = shalt.err (!%p524_p2)
}
   0xb   :  { %s528_s16 = scalar_lea.vmem %s36_s28, 2048  ;;  %p533_p4 = scmp.lt.s32.totalorder %s36_s28, %s36_s28 }
   0xc   :  { %p529_p3 = scmp.ne.s32.totalorder %s36_s28, %s528_s16  ;;  %p534_p5 = scmp.lt.s32.totalorder %s528_s16, %s528_s16 }
   0xe   :  { %p535_p6 = por %p534_p5, %p533_p4 }
  0x10   :  { %p536_p7 = pnand %p535_p6, %p529_p3 }
  0x12   :  { %539 = shalt.err (!%p536_p7)
}
  0x13   :  { %s660_s17 = smov 128   ;;  %s661_s18 = smov 8  }
  0x14   :  { %41 = dma.hbm_to_vmem [thread:$0]  %s828_s1, 2048, %s36_s28, [#allocation6], %s660_s17, %s660_s17, %s661_s18  }
  0x15   :  { %s540_s23 = scalar_lea.hbm %s827_s0, 256 }
  0x16   :  { %p541_p8 = scmp.ne.s32.totalorder %s827_s0, %s540_s23  ;;  %p544_p9 = scmp.lt.u32.totalorder %s540_s23, %s827_s0 }
  0x18   :  { %p546_p10 = pnand %p544_p9, %p541_p8 }
  0x1a   :  { %549 = shalt.err (!%p546_p10)
}
  0x1b   :  { %s550_s29 = scalar_lea.vmem %s711_s30, 256  ;;  %p555_p12 = scmp.lt.s32.totalorder %s711_s30, %s711_s30 }
  0x1c   :  { %p551_p11 = scmp.ne.s32.totalorder %s711_s30, %s550_s29  ;;  %p556_p13 = scmp.lt.s32.totalorder %s550_s29, %s550_s29 }
  0x1e   :  { %p557_p0 = por %p556_p13, %p555_p12 }
  0x20   :  { %p558_p1 = pnand %p557_p0, %p551_p11 }
  0x22   :  { %561 = shalt.err (!%p558_p1)
}
  0x23   :  { %29 = dma.hbm_to_vmem [thread:$0]  %s827_s0, 256, %s711_s30, [#allocation3], %s660_s17, %s660_s17, %s661_s18  }
  0x24   :  { %s662_s9 = smov [#allocation7]   ;;  %s562_s13 = scalar_lea.hbm %s830_s3, 2048 }
  0x25   :  { %s49_s10 = sshll.u32 %s662_s9, 4  ;;  %p563_p2 = scmp.ne.s32.totalorder %s830_s3, %s562_s13  ;;  %s50_s10 = int_to_ptr.vmem [resolvable:$true] %s49_s10 }
  0x26   :  { %p566_p3 = scmp.lt.u32.totalorder %s562_s13, %s830_s3 }
  0x28   :  { %p568_p4 = pnand %p566_p3, %p563_p2 }
  0x2a   :  { %571 = shalt.err (!%p568_p4)
}
  0x2b   :  { %s572_s20 = scalar_lea.vmem %s50_s10, 2048  ;;  %p577_p6 = scmp.lt.s32.totalorder %s50_s10, %s50_s10 }
  0x2c   :  { %p573_p5 = scmp.ne.s32.totalorder %s50_s10, %s572_s20  ;;  %p578_p7 = scmp.lt.s32.totalorder %s572_s20, %s572_s20 }
  0x2e   :  { %p579_p8 = por %p578_p7, %p577_p6 }
  0x30   :  { %p580_p9 = pnand %p579_p8, %p573_p5 }
  0x32   :  { %583 = shalt.err (!%p580_p9)
}
  0x33   :  { %55 = dma.hbm_to_vmem [thread:$0]  %s830_s3, 2048, %s50_s10, [#allocation6], %s660_s17, %s660_s17, %s661_s18  }
  0x34   :  { %650 = dma.done.wait [#allocation3], 256  }
  0x35   :  { %651 = vsyncadd [#allocation3], 4294967040 }
  0x36   :  { %652 = dma.done.wait [#allocation6], 4096  }
  0x37   :  { %653 = vsyncadd [#allocation6], 4294963200  ;;  %v169_v0 = vld [vmem:[#allocation7] sm:$0xff]  ;;  %v170_v1 = vld [vmem:[#allocation7 + $0x8] sm:$0xff]  ;;  %s663_s24 = smov [#allocation9]   ;;  %s664_s26 = smov [#allocation11]  }
  0x38   :  { %v171_v2 = vld [vmem:[#allocation7 + $0x10] sm:$0xff]  ;;  %v474_v3 = vpack.c.bf16 %v170_v1, %v169_v0  ;;  %v172_v4 = vld [vmem:[#allocation7 + $0x18] sm:$0xff]  ;;  %v173_v6 = vld [vmem:[#allocation7 + $0x20] sm:$0xff]  ;;  %s302_s25 = sshll.u32 %s663_s24, 4  ;;  %s314_s27 = sshll.u32 %s664_s26, 4  ;;  %s303_s25 = int_to_ptr.vmem [resolvable:$true] %s302_s25  ;;  %s769_s27 = int_to_ptr.vmem [resolvable:$true] %s314_s27 }
  0x39   :  { %v478_v5 = vpack.c.bf16 %v172_v4, %v171_v2  ;;  %v174_v7 = vld [vmem:[#allocation7 + $0x28] sm:$0xff]  ;;  %v71_v8 = vld [vmem:[#allocation5] sm:$0xff]  ;;  %v73_v11 = vld [vmem:[#allocation5 + $0x10] sm:$0xff]  ;;  %p589_p11 = scmp.lt.s32.totalorder %s303_s25, %s303_s25 }
  0x3a   :  { %475 = vmatprep.subr.bf16.mxu1 %v474_v3  ;;  %v72_v9 = vld [vmem:[#allocation5 + $0x8] sm:$0xff]  ;;  %v74_v12 = vld [vmem:[#allocation5 + $0x18] sm:$0xff]  ;;  %v482_v13 = vpack.c.bf16 %v174_v7, %v173_v6  ;;  %v75_v15 = vld [vmem:[#allocation5 + $0x20] sm:$0xff] }
  0x3b   :  { %477 = vmatpush3.bf16.msra.mxu1 %v474_v3  ;;  %v442_v10 = vpack.c.bf16 %v72_v9, %v71_v8  ;;  %v446_v14 = vpack.c.bf16 %v74_v12, %v73_v11  ;;  %v76_v16 = vld [vmem:[#allocation5 + $0x28] sm:$0xff]  ;;  %v175_v17 = vld [vmem:[#allocation7 + $0x30] sm:$0xff]  ;;  %v176_v18 = vld [vmem:[#allocation7 + $0x38] sm:$0xff] }
  0x3c   :  { %479 = vmatprep.subr.bf16.mxu1 %v478_v5  ;;  %v450_v19 = vpack.c.bf16 %v76_v16, %v75_v15  ;;  %v69_v20 = vld [vmem:[#allocation2] sm:$0xff]  ;;  %v486_v21 = vpack.c.bf16 %v176_v18, %v175_v17  ;;  %v78_v23 = vld [vmem:[#allocation5 + $0x38] sm:$0xff]  ;;  %v177_v24 = vld [vmem:[#allocation7 + $0x40] sm:$0xff] }
  0x3d   :  { %443 = vmatprep.subr.bf16.mxu0 %v442_v10  ;;  %v77_v22 = vld [vmem:[#allocation5 + $0x30] sm:$0xff]  ;;  %439 = vmatprep.mubr.f32.mxu1 %v69_v20  ;;  %v178_v25 = vld [vmem:[#allocation7 + $0x48] sm:$0xff]  ;;  %v79_v28 = vld [vmem:[#allocation5 + $0x40] sm:$0xff] }
  0x3e   :  { %445 = vmatpush3.bf16.msra.mxu0 %v442_v10  ;;  %404 = vmatprep.mubr.f32.mxu0 %v69_v20  ;;  %v454_v26 = vpack.c.bf16 %v78_v23, %v77_v22  ;;  %v490_v27 = vpack.c.bf16 %v178_v25, %v177_v24  ;;  %v80_v29 = vld [vmem:[#allocation5 + $0x48] sm:$0xff]  ;;  %v179_v30 = vld [vmem:[#allocation7 + $0x50] sm:$0xff]  ;;  %v180_v31 = vld [vmem:[#allocation7 + $0x58] sm:$0xff] }
  0x3f   :  { %481 = vmatpush3.bf16.msra.mxu1 %v478_v5  ;;  %447 = vmatprep.subr.bf16.mxu0 %v446_v14  ;;  %v458_v32 = vpack.c.bf16 %v80_v29, %v79_v28  ;;  %v494_v33 = vpack.c.bf16 %v180_v31, %v179_v30  ;;  %v81_v34 = vld [vmem:[#allocation5 + $0x50] sm:$0xff]  ;;  %v82_v35 = vld [vmem:[#allocation5 + $0x58] sm:$0xff]  ;;  %v181_v36 = vld [vmem:[#allocation7 + $0x60] sm:$0xff] }
  0x40   :  { %483 = vmatprep.subr.bf16.mxu1 %v482_v13  ;;  %v182_v37 = vld [vmem:[#allocation7 + $0x68] sm:$0xff]  ;;  %v462_v38 = vpack.c.bf16 %v82_v35, %v81_v34  ;;  %v83_v40 = vld [vmem:[#allocation5 + $0x60] sm:$0xff]  ;;  %v183_v42 = vld [vmem:[#allocation7 + $0x70] sm:$0xff] }
  0x41   :  { %v498_v39 = vpack.c.bf16 %v182_v37, %v181_v36  ;;  %v84_v41 = vld [vmem:[#allocation5 + $0x68] sm:$0xff]  ;;  %v184_v43 = vld [vmem:[#allocation7 + $0x78] sm:$0xff]  ;;  %v85_v46 = vld [vmem:[#allocation5 + $0x70] sm:$0xff] }
  0x42   :  { %449 = vmatpush3.bf16.msra.mxu0 %v446_v14  ;;  %v466_v44 = vpack.c.bf16 %v84_v41, %v83_v40  ;;  %v502_v45 = vpack.c.bf16 %v184_v43, %v183_v42  ;;  %v86_v47 = vld [vmem:[#allocation5 + $0x78] sm:$0xff]  ;;  %v335_v50 = vld [vmem:[%s831_s4] ss:$0 sm:$0xff] }
  0x43   :  { %485 = vmatpush3.bf16.msra.mxu1 %v482_v13  ;;  %451 = vmatprep.subr.bf16.mxu0 %v450_v19  ;;  %v470_v48 = vpack.c.bf16 %v86_v47, %v85_v46  ;;  %v70_v49 = vld [vmem:[#allocation2 + $0x8] sm:$0xff]  ;;  %v334_v54 = vld [vmem:[%s829_s2] ss:$0 sm:$0xff]  ;;  %s584_s2 = scalar_lea.vmem %s303_s25, 256 }
  0x44   :  { %487 = vmatprep.subr.bf16.mxu1 %v486_v21  ;;  %p585_p10 = scmp.ne.s32.totalorder %s303_s25, %s584_s2  ;;  %p590_p12 = scmp.lt.s32.totalorder %s584_s2, %s584_s2 }
  0x46   :  { %453 = vmatpush3.bf16.msra.mxu0 %v450_v19  ;;  %p591_p13 = por %p590_p12, %p589_p11 }
  0x47   :  { %489 = vmatpush3.bf16.msra.mxu1 %v486_v21  ;;  %455 = vmatprep.subr.bf16.mxu0 %v454_v26 }
  0x48   :  { %491 = vmatprep.subr.bf16.mxu1 %v490_v27  ;;  %p592_p0 = pnand %p591_p13, %p585_p10 }
  0x4a   :  { %457 = vmatpush3.bf16.msra.mxu0 %v454_v26 }
  0x4b   :  { %493 = vmatpush3.bf16.msra.mxu1 %v490_v27  ;;  %459 = vmatprep.subr.bf16.mxu0 %v458_v32 }
  0x4c   :  { %495 = vmatprep.subr.bf16.mxu1 %v494_v33 }
  0x4e   :  { %461 = vmatpush3.bf16.msra.mxu0 %v458_v32 }
  0x4f   :  { %497 = vmatpush3.bf16.msra.mxu1 %v494_v33  ;;  %463 = vmatprep.subr.bf16.mxu0 %v462_v38 }
  0x50   :  { %499 = vmatprep.subr.bf16.mxu1 %v498_v39 }
  0x52   :  { %465 = vmatpush3.bf16.msra.mxu0 %v462_v38 }
  0x53   :  { %501 = vmatpush3.bf16.msra.mxu1 %v498_v39  ;;  %467 = vmatprep.subr.bf16.mxu0 %v466_v44 }
  0x54   :  { %503 = vmatprep.subr.bf16.mxu1 %v502_v45 }
  0x56   :  { %469 = vmatpush3.bf16.msra.mxu0 %v466_v44 }
  0x57   :  { %505 = vmatpush3.bf16.msra.mxu1 %v502_v45  ;;  %471 = vmatprep.subr.bf16.mxu0 %v470_v48 }
  0x5a   :  { %440 = vmatmul.mubr.f32.vlgmr.msra.gmra.mrb[0].mxu1 %v70_v49  ;;  %473 = vmatpush3.bf16.msra.mxu0 %v470_v48 }
  0x5d   :  { %405 = vmatmul.mubr.f32.vlgmr.msra.gmra.mrb[0].mxu0 %v70_v49 }
 0x12d   :  { %v441_v51 = vpop.f32.mrb[0].mxu1 }
 0x12e   :  { %v264_v52 = vadd.f32 %v441_v51, %v335_v50  ;;  %v258_v53 = vpop.f32.mrb[1].mxu1 }
 0x12f   :  { %v259_v55 = vadd.f32 %v335_v50, %v258_v53 }
 0x130   :  { %v268_v56 = vmul.f32 0.5, %v264_v52  ;;  %284 = vst [vmem:[#allocation11 + $0x8] sm:$0xff] %v264_v52  ;;  %v406_v57 = vpop.f32.mrb[0].mxu0 }
 0x131   :  { %v267_v58 = vmul.f32 0.5, %v259_v55  ;;  %283 = vst [vmem:[#allocation11] sm:$0xff] %v259_v55  ;;  %v166_v59 = vadd.f32 %v406_v57, %v334_v54  ;;  %v160_v60 = vpop.f32.mrb[1].mxu0 }
 0x132   :  { %v271_v61 = vmul.f32 1.442695, %v268_v56  ;;  %v161_v62 = vadd.f32 %v334_v54, %v160_v60 }
 0x133   :  { %v269_v63 = vmul.f32 1.442695, %v267_v58  ;;  %282 = vst [vmem:[#allocation9 + $0x8] sm:$0xff] %v166_v59 }
 0x134   :  { %514 = vpow2.f32 %v271_v61  ;;  %281 = vst [vmem:[#allocation9] sm:$0xff] %v161_v62 }
 0x135   :  { %516 = vpow2.f32 %v269_v63 }
 0x136   :  { %595 = shalt.err (!%p592_p0)
}
 0x137   :  { %s596_s1 = scalar_lea.hbm %s834_s7, 256 }
 0x138   :  { %p597_p1 = scmp.ne.s32.totalorder %s834_s7, %s596_s1  ;;  %p600_p2 = scmp.lt.u32.totalorder %s596_s1, %s834_s7 }
 0x13a   :  { %p602_p3 = pnand %p600_p2, %p597_p1 }
 0x13c   :  { %605 = shalt.err (!%p602_p3)
}
 0x13d   :  { %308 = dma.vmem_to_hbm [thread:$0]  %s303_s25, 256, %s834_s7, [#allocation10], %s660_s17, %s660_s17, %s661_s18  }
 0x13e   :  { %s606_s14 = scalar_lea.vmem %s769_s27, 256  ;;  %p611_p5 = scmp.lt.s32.totalorder %s769_s27, %s769_s27 }
 0x13f   :  { %p607_p4 = scmp.ne.s32.totalorder %s769_s27, %s606_s14  ;;  %p612_p6 = scmp.lt.s32.totalorder %s606_s14, %s606_s14 }
 0x141   :  { %p613_p7 = por %p612_p6, %p611_p5 }
 0x143   :  { %p614_p8 = pnand %p613_p7, %p607_p4 }
 0x145   :  { %617 = shalt.err (!%p614_p8)
}
 0x146   :  { %s618_s19 = scalar_lea.hbm %s835_s8, 256 }
 0x147   :  { %p619_p9 = scmp.ne.s32.totalorder %s835_s8, %s618_s19  ;;  %p622_p10 = scmp.lt.u32.totalorder %s618_s19, %s835_s8 }
 0x149   :  { %p624_p11 = pnand %p622_p10, %p619_p9 }
 0x14b   :  { %627 = shalt.err (!%p624_p11)
}
 0x14c   :  { %320 = dma.vmem_to_hbm [thread:$0]  %s769_s27, 256, %s835_s8, [#allocation10], %s660_s17, %s660_s17, %s661_s18   ;;  %v515_v2 = vpop.eup %514 }
 0x14d   :  { %v274_v0 = vld [vmem:[%s832_s5 + $0x8] sm:$0xff]  ;;  %v273_v1 = vld [vmem:[%s832_s5] sm:$0xff]  ;;  %v517_v3 = vpop.eup %516  ;;  %s665_s26 = smov [#allocation8]  }
 0x14e   :  { %v276_v4 = vmul.f32 %v515_v2, %v274_v0  ;;  %s290_s2 = sshll.u32 %s665_s26, 4  ;;  %v275_v5 = vmul.f32 %v517_v3, %v273_v1  ;;  %s291_s2 = int_to_ptr.vmem [resolvable:$true] %s290_s2 }
 0x14f   :  { %s628_s8 = scalar_lea.vmem %s291_s2, 256  ;;  %p633_p13 = scmp.lt.s32.totalorder %s291_s2, %s291_s2 }
 0x150   :  { %v278_v6 = vadd.f32 %v276_v4, %v166_v59  ;;  %v277_v7 = vadd.f32 %v275_v5, %v161_v62  ;;  %p629_p12 = scmp.ne.s32.totalorder %s291_s2, %s628_s8  ;;  %p634_p0 = scmp.lt.s32.totalorder %s628_s8, %s628_s8 }
 0x152   :  { %280 = vst [vmem:[#allocation8 + $0x8] sm:$0xff] %v278_v6  ;;  %279 = vst [vmem:[#allocation8] sm:$0xff] %v277_v7  ;;  %p635_p1 = por %p634_p0, %p633_p13 }
 0x154   :  { %p636_p2 = pnand %p635_p1, %p629_p12 }
 0x156   :  { %639 = shalt.err (!%p636_p2)
}
 0x157   :  { %s640_s4 = scalar_lea.hbm %s833_s6, 256 }
 0x158   :  { %p641_p3 = scmp.ne.s32.totalorder %s833_s6, %s640_s4  ;;  %p644_p4 = scmp.lt.u32.totalorder %s640_s4, %s833_s6 }
 0x15a   :  { %p646_p5 = pnand %p644_p4, %p641_p3 }
 0x15c   :  { %649 = shalt.err (!%p646_p5)
}
 0x15d   :  { %296 = dma.vmem_to_hbm [thread:$0]  %s291_s2, 256, %s833_s6, [#allocation4], %s660_s17, %s660_s17, %s661_s18  }
 0x15e   :  { %654 = dma.done.wait [#allocation4], 256  }
 0x15f   :  { %655 = vsyncadd [#allocation4], 4294967040 }
 0x160   :  { %656 = dma.done.wait [#allocation10], 512  }
 0x161   :  { %657 = vsyncadd [#allocation10], 4294966784 }
 0x162   :  { %330 = vsyncpa [#allocation3], 1 }
 0x163   :  { %331 = vsyncpa [#allocation6], 1 }
 0x164   :  { %332 = vsyncpa [#allocation4], 1 }
 0x165   :  { %333 = vsyncpa [#allocation10], 1 }

</bundles_post_ra>
